<compile_context>
chip_gen: v7x
topology: tpu7x:2x2x1
jax: 0.10.0
libtpu: 0.0.40
codegen_flags: <defaults>
</compile_context>

<pallas_src>
import math
import functools

import jax
import jax.numpy as jnp
from jax import lax
from jax.experimental import pallas as pl
from jax.experimental.pallas import tpu as pltpu


# Explicit scoped-VMEM limit: > v5e/v6e default scoped limits, < v7x's 64 MiB
# per-TensorCore physical VMEM (the ("parallel",) grid is split across 2 TCs on
# v7x but each TC still only has 64 MiB).
_VMEM_LIMIT_BYTES = 48 << 20
# Accounted footprint target; leaves slack under the limit for compiler scratch
# and vreg spills.
_VMEM_BUDGET_BYTES = 32 << 20
_MAX_BLOCK_ROWS = 1024


# ----------------------------------------------------------------------------
# Pallas kernel: VQ inference quantization for one batch tile.
#   inputs : h (TB, D), codebook (K, D) in h.dtype, 0.5*||c||^2 (1, K) f32
#   outputs: q one-hot (TB, K), indices (TB, 1) i32
# ----------------------------------------------------------------------------
def _vq_kernel(h_ref, cb_ref, half_cbsq_ref, q_ref, idx_ref):
    h = h_ref[...]                  # (TB, D) native dtype (bf16 stays bf16 on MXU)
    cb = cb_ref[...]                # (K, D) same dtype as h, VMEM-resident
    half_cbsq = half_cbsq_ref[...]  # (1, K) f32, precomputed outside the kernel

    TB = h.shape[0]
    K = cb.shape[0]

    # argmin_k ||h - c_k||^2 == argmin_k (0.5*||c_k||^2 - h.c_k)
    # (||h||^2 is a per-row constant and cannot change the argmin -> dropped).
    sim = lax.dot_general(h, cb, (((1,), (1,)), ((), ())),
                          preferred_element_type=jnp.float32)     # (TB, K) MXU
    dist = half_cbsq - sim                                        # (TB, K) f32

    # argmin over codes (first occurrence on ties, like torch.argmin)
    col = lax.broadcasted_iota(jnp.int32, (TB, K), 1)
    min_d = jnp.min(dist, axis=1, keepdims=True)
    idx = jnp.min(jnp.where(dist == min_d, col, K), axis=1, keepdims=True)
    # NOTE: garbage rows of a padded partial last tile may yield idx == K
    # (all-false mask).  Those rows are masked off on writeback and idx is never
    # used to index a ref inside the kernel, so this is harmless by design.

    q_ref[...] = (col == idx).astype(q_ref.dtype)   # 0/1: exact in bf16/int8
    idx_ref[...] = idx


def _choose_block_rows(B, D, K, h_bytes, q_bytes,
                       budget_bytes=_VMEM_BUDGET_BYTES,
                       max_rows=_MAX_BLOCK_ROWS):
    """Largest MXU-friendly batch tile fitting the accounted VMEM budget."""
    if B <= 128:
        return B                                  # single tile, full array dims
    Kp = ((K + 127) // 128) * 128                 # lane padding of (TB, K) tiles
    # Double-buffered HBM<->VMEM blocks per row: h, q, idx (idx (tb,1) pads to
    # 128 lanes in VMEM) plus f32 in-kernel intermediates (sim/dist/one-hot).
    per_row = 2 * D * h_bytes + 2 * Kp * q_bytes + 2 * 128 * 4 + 3 * Kp * 4
    # Resident codebook + norms.  Constant index_map -> fetched once, but the
    # pipeline still allocates a second buffer; account for both copies.
    # TODO(synk): single-buffer via pipeline_mode=pl.Buffered(1) once confirmed
    # supported by the grid pipeliner; budgeted for 2x here to stay safe.
    fixed = 2 * (K * D * h_bytes + 8 * Kp * 4)
    avail = max(budget_bytes - fixed, 128 * per_row)
    tb = min(B, max_rows, avail // per_row)
    # Full-height MXU passes: multiples of 256 on v6e/v7x (2x128 on v5e).
    tb = (tb // 256) * 256 if tb >= 256 else 128
    return int(min(tb, B))


@functools.partial(jax.jit, static_argnames=("block_rows", "q_dtype", "backend"))
def vq_quantize(h, codebook, *, block_rows=None, q_dtype=jnp.bfloat16,
                backend="pallas"):
    """Fused VQ inference (training=False path).  h: [B, D], codebook: [K, D].

    Returns (q, c_hard, idx):
      q      : [B, K] one-hot assignments in q_dtype (0/1 exact in bf16/int8)
      c_hard : [B, D] gathered codebook rows (original codebook dtype, bit-exact)
      idx    : [B]    int32 argmin indices

    NOTE: if h is bf16 the distance matmul runs in bf16 on the MXU (f32 accum);
    argmin may differ from an f32 reference on near-ties.  Pass f32 activations
    when exact parity with the f32 PyTorch math is required.
    """
    B, D = h.shape
    K, Dc = codebook.shape
    assert D == Dc
    assert backend in ("pallas", "xla", "auto")

    # Codebook for the distance matmul in h's dtype (pure-bf16 MXU path when
    # activations are bf16); 0.5*||c||^2 precomputed once in f32.
    cb_mm = codebook.astype(h.dtype)
    half_cbsq = 0.5 * jnp.sum(cb_mm.astype(jnp.float32) ** 2, axis=1)[None, :]

    if backend == "auto":
        backend = "xla" if (K < 128 and D < 128) else "pallas"

    if backend == "xla":
        # Tiny K and D: (8,128) lane padding makes a Pallas tile pure overhead;
        # this fused XLA path computes the identical math.
        sim = jnp.dot(h, cb_mm.T, preferred_element_type=jnp.float32)
        dist = half_cbsq - sim
        idx = jnp.argmin(dist, axis=1).astype(jnp.int32)
        q = jax.nn.one_hot(idx, K, dtype=q_dtype)
        c_hard = jnp.take(codebook, idx, axis=0)
        return q, c_hard, idx

    if block_rows is None:
        tb = _choose_block_rows(B, D, K, jnp.dtype(h.dtype).itemsize,
                                jnp.dtype(q_dtype).itemsize)
    else:
        tb = max(1, min(int(block_rows), B))
        if tb < B and tb % 8 != 0:
            tb = max(8, (tb // 8) * 8)

    grid = (pl.cdiv(B, tb),)
    out_shapes = (
        jax.ShapeDtypeStruct((B, K), q_dtype),
        jax.ShapeDtypeStruct((B, 1), jnp.int32),
    )
    q, idx2d = pl.pallas_call(
        _vq_kernel,
        out_shape=out_shapes,
        grid=grid,
        in_specs=[
            pl.BlockSpec((tb, D), lambda i: (i, 0)),   # batch-tiled activations
            pl.BlockSpec((K, D), lambda i: (0, 0)),    # codebook: VMEM-resident
            pl.BlockSpec((1, K), lambda i: (0, 0)),    # 0.5*||c||^2: resident
        ],
        out_specs=(
            pl.BlockSpec((tb, K), lambda i: (i, 0)),   # lane-dense q writeback
            pl.BlockSpec((tb, 1), lambda i: (i, 0)),   # tiny idx block
        ),
        compiler_params=pltpu.CompilerParams(
            dimension_semantics=("parallel",),          # v7x: shard across TCs
            vmem_limit_bytes=_VMEM_LIMIT_BYTES),
    )(h, cb_mm, half_cbsq)

    idx = idx2d[:, 0]
    # Hard code = codebook[idx]: bit-exact gather from the ORIGINAL codebook
    # (replaces the former in-kernel f32 one-hot matmul).
    c_hard = jnp.take(codebook, idx, axis=0)
    # TODO(synk): for codebooks too large for VMEM, add a trailing "arbitrary"
    # K grid axis with running (min_dist, argmin) scratch accumulators.
    return q, c_hard, idx


# ----------------------------------------------------------------------------
# JAX-side module glue (parameter setup + dict assembly)
# ----------------------------------------------------------------------------
def init_codebook(key, num_codes, code_dim):
    # kaiming_uniform_(a=sqrt(5)) on a (num_codes, code_dim) weight
    # => U(-1/sqrt(fan_in), 1/sqrt(fan_in)), fan_in = code_dim
    bound = 1.0 / math.sqrt(code_dim)
    return jax.random.uniform(
        key, (num_codes, code_dim), jnp.float32, minval=-bound, maxval=bound)


class DualVQQuantizer:
    """Inference-mode DualVQQuantizer (training=False path of the PyTorch module).

    Defaults mirror the PyTorch module: use_cdist=False, normalize=False,
    coupling=False.
    """

    def __init__(self, code_dim_tr, code_dim_re, num_codes_tr, num_codes_re,
                 key, q_dtype=jnp.bfloat16, backend="pallas"):
        k_tr, k_re = jax.random.split(key)
        self.codebook_tr = init_codebook(k_tr, num_codes_tr, code_dim_tr)
        self.codebook_re = init_codebook(k_re, num_codes_re, code_dim_re)
        self.q_dtype = q_dtype
        self.backend = backend

    def __call__(self, h_tr, h_re):
        q_tr, hard_tr, idx_tr = vq_quantize(
            h_tr, self.codebook_tr, q_dtype=self.q_dtype, backend=self.backend)
        q_re, hard_re, idx_re = vq_quantize(
            h_re, self.codebook_re, q_dtype=self.q_dtype, backend=self.backend)
        # inference: c_tilde == c_hard == c_quantized, loss == None
        return {
            "q_tr": q_tr, "soft_tr": hard_tr, "hard_tr": hard_tr,
            "quantized_tr": hard_tr, "indices_tr": idx_tr,
            "q_re": q_re, "soft_re": hard_re, "hard_re": hard_re,
            "quantized_re": hard_re, "indices_re": idx_re,
            "loss": None,
        }
    # TODO(synk): training=True branch (gumbel_softmax sampling, MSE/commitment
    # losses, coupling MLP + KL) is a stochastic training path not reproduced.


# ----------------------------------------------------------------------------
# Pure-JAX reference (PyTorch math, no Pallas) for correctness checks
# ----------------------------------------------------------------------------
def _vq_ref(h, cb):
    h = h.astype(jnp.float32)
    cb = cb.astype(jnp.float32)
    h_sq = jnp.sum(h * h, axis=1, keepdims=True)
    cb_sq = jnp.sum(cb * cb, axis=1)[None, :]
    dist = h_sq + cb_sq - 2.0 * (h @ cb.T)
    idx = jnp.argmin(dist, axis=1)
    q = jax.nn.one_hot(idx, cb.shape[0], dtype=jnp.float32)
    return q, cb[idx], idx.astype(jnp.int32), dist


if __name__ == "__main__":
    key = jax.random.PRNGKey(0)
    k_mod, k_htr, k_hre, k_big, k_bf = jax.random.split(key, 5)

    # small demo shapes consistent with the module
    B = 8
    code_dim_tr, num_codes_tr = 32, 16
    code_dim_re, num_codes_re = 16, 8

    model = DualVQQuantizer(code_dim_tr, code_dim_re,
                            num_codes_tr, num_codes_re, k_mod,
                            backend="pallas")

    h_tr = jax.random.normal(k_htr, (B, code_dim_tr), jnp.float32)
    h_re = jax.random.normal(k_hre, (B, code_dim_re), jnp.float32)

    out = model(h_tr, h_re)
    jax.block_until_ready(out["quantized_tr"])
    jax.block_until_ready(out["quantized_re"])

    # correctness vs. pure-JAX reference (f32 inputs -> exact argmin expected)
    for (h, cb, qk, hk, ik) in [
        (h_tr, model.codebook_tr, "q_tr", "hard_tr", "indices_tr"),
        (h_re, model.codebook_re, "q_re", "hard_re", "indices_re"),
    ]:
        q_ref, hard_ref, idx_ref, _ = _vq_ref(h, cb)
        assert jnp.array_equal(out[ik], idx_ref)
        assert jnp.allclose(out[qk].astype(jnp.float32), q_ref)
        assert jnp.allclose(out[hk], hard_ref)

    # auto backend dispatches tiny K,D to the fused XLA path — same results
    q_a, c_a, i_a = vq_quantize(h_tr, model.codebook_tr, backend="auto")
    assert jnp.array_equal(i_a, out["indices_tr"])

    # multi-step batch-tiled grid path (incl. a partial last tile), f32
    Kb, Db, Bb = 200, 256, 300
    cb_big = init_codebook(k_big, Kb, Db)
    h_big = jax.random.normal(jax.random.fold_in(k_big, 1), (Bb, Db), jnp.float32)
    q_b, c_b, i_b = vq_quantize(h_big, cb_big, block_rows=128)
    jax.block_until_ready(c_b)
    q_r, c_r, i_r, dist_r = _vq_ref(h_big, cb_big)
    rows = jnp.arange(Bb)
    # robust check: the kernel's pick must be (numerically) optimal, and the
    # q / c_hard outputs must be self-consistent with its indices
    assert bool(jnp.all(dist_r[rows, i_b] <= dist_r[rows, i_r] + 1e-3))
    assert jnp.array_equal(jnp.argmax(q_b.astype(jnp.float32), axis=1), i_b)
    assert jnp.allclose(jnp.sum(q_b.astype(jnp.float32), axis=1), 1.0)
    assert jnp.allclose(c_b, cb_big[i_b])

    # bf16 activation smoke test (pure-bf16 MXU distance matmul)
    h_bf = jax.random.normal(k_bf, (256, 256)).astype(jnp.bfloat16)
    cb_bf = init_codebook(jax.random.fold_in(k_bf, 1), 256, 256)
    q_f, c_f, i_f = vq_quantize(h_bf, cb_bf, q_dtype=jnp.bfloat16)
    jax.block_until_ready(c_f)
    assert bool(jnp.all((i_f >= 0) & (i_f < 256)))
    assert jnp.array_equal(jnp.argmax(q_f.astype(jnp.float32), axis=1), i_f)
    assert jnp.allclose(c_f, cb_bf[i_f])

    print("KERNEL_OK")
</pallas_src>

<mosaic_0001>
module attributes {stable_mosaic.version = 11 : i64} {
  func.func @_vq_kernel(%arg0: i32, %arg1: memref<8x32xf32, #tpu.memory_space<vmem>>, %arg2: memref<16x32xf32, #tpu.memory_space<vmem>>, %arg3: memref<1x16xf32, #tpu.memory_space<vmem>>, %arg4: memref<8x16xbf16, #tpu.memory_space<vmem>>, %arg5: memref<8x1xi32, #tpu.memory_space<vmem>>) attributes {dimension_semantics = [#tpu.dimension_semantics<parallel>], iteration_bounds = array<i64: 1>, scalar_prefetch = 0 : i64, scratch_operands = 0 : i64, tpu.core_type = #tpu.core_type<tc>, window_params = [{transform_indices = @transform_0, window_bounds = array<i64: 8, 32>}, {pipeline_mode = #tpu.pipeline_mode<synchronous>, transform_indices = @transform_1, window_bounds = array<i64: 16, 32>}, {pipeline_mode = #tpu.pipeline_mode<synchronous>, transform_indices = @transform_2, window_bounds = array<i64: 1, 16>}, {transform_indices = @transform_3, window_bounds = array<i64: 8, 16>}, {transform_indices = @transform_4, window_bounds = array<i64: 8, 1>}]} {
    %c0 = arith.constant 0 : index
    %c0_0 = arith.constant 0 : index
    %0 = vector.load %arg1[%c0, %c0_0] : memref<8x32xf32, #tpu.memory_space<vmem>>, vector<8x32xf32>
    %c0_1 = arith.constant 0 : index
    %c0_2 = arith.constant 0 : index
    %1 = vector.load %arg2[%c0_1, %c0_2] : memref<16x32xf32, #tpu.memory_space<vmem>>, vector<16x32xf32>
    %c0_3 = arith.constant 0 : index
    %c0_4 = arith.constant 0 : index
    %2 = vector.load %arg3[%c0_3, %c0_4] : memref<1x16xf32, #tpu.memory_space<vmem>>, vector<1x16xf32>
    %cst = arith.constant dense<0.000000e+00> : vector<8x16xf32>
    %3 = tpu.matmul %0, %1, %cst {dimension_numbers = #tpu.dot_dimension_numbers<[1], [1], [0], [0], [0, 0, 1, 0], [], []>} : vector<8x32xf32>, vector<16x32xf32>, vector<8x16xf32> -> vector<8x16xf32>
    %4 = vector.broadcast %2 : vector<1x16xf32> to vector<8x16xf32>
    %5 = arith.subf %4, %3 : vector<8x16xf32>
    %6 = tpu.iota {dimensions = array<i32: 1>} : vector<8x16xi32>
    %cst_5 = arith.constant dense<0x7F800000> : vector<8xf32>
    %7 = vector.multi_reduction <minimumf>, %5, %cst_5 [1] : vector<8x16xf32> to vector<8xf32>
    %8 = vector.shape_cast %7 : vector<8xf32> to vector<8x1xf32>
    %9 = vector.broadcast %8 : vector<8x1xf32> to vector<8x16xf32>
    %10 = arith.cmpf oeq, %5, %9 : vector<8x16xf32>
    %c16_i32 = arith.constant 16 : i32
    %11 = vector.broadcast %c16_i32 : i32 to vector<8x16xi32>
    %12 = arith.select %10, %6, %11 : vector<8x16xi1>, vector<8x16xi32>
    %cst_6 = arith.constant dense<2147483647> : vector<8xi32>
    %13 = vector.multi_reduction <minsi>, %12, %cst_6 [1] : vector<8x16xi32> to vector<8xi32>
    %14 = vector.shape_cast %13 : vector<8xi32> to vector<8x1xi32>
    %15 = vector.broadcast %14 : vector<8x1xi32> to vector<8x16xi32>
    %16 = arith.cmpi eq, %6, %15 : vector<8x16xi32>
    %17 = arith.extui %16 : vector<8x16xi1> to vector<8x16xi32>
    %18 = arith.sitofp %17 : vector<8x16xi32> to vector<8x16xf32>
    %19 = arith.truncf %18 : vector<8x16xf32> to vector<8x16xbf16>
    %c0_7 = arith.constant 0 : index
    %c0_8 = arith.constant 0 : index
    %20 = vector.load %arg4[%c0_7, %c0_8] : memref<8x16xbf16, #tpu.memory_space<vmem>>, vector<8x16xbf16>
    tpu.vector_store %arg4[%c0_7, %c0_8], %19 {strides = array<i32>} : memref<8x16xbf16, #tpu.memory_space<vmem>>, vector<8x16xbf16>,
    %c0_9 = arith.constant 0 : index
    %c0_10 = arith.constant 0 : index
    %21 = vector.load %arg5[%c0_9, %c0_10] : memref<8x1xi32, #tpu.memory_space<vmem>>, vector<8x1xi32>
    tpu.vector_store %arg5[%c0_9, %c0_10], %14 {strides = array<i32>} : memref<8x1xi32, #tpu.memory_space<vmem>>, vector<8x1xi32>,
    return
  }
  func.func @transform_0(%arg0: i32) -> (i32, i32) {
    %c0_i32 = arith.constant 0 : i32
    %c0_i32_0 = arith.constant 0 : i32
    return %arg0, %c0_i32 : i32, i32
  }
  func.func @transform_1(%arg0: i32) -> (i32, i32) {
    %c0_i32 = arith.constant 0 : i32
    %c0_i32_0 = arith.constant 0 : i32
    %c0_i32_1 = arith.constant 0 : i32
    return %c0_i32, %c0_i32_0 : i32, i32
  }
  func.func @transform_2(%arg0: i32) -> (i32, i32) {
    %c0_i32 = arith.constant 0 : i32
    %c0_i32_0 = arith.constant 0 : i32
    %c0_i32_1 = arith.constant 0 : i32
    return %c0_i32, %c0_i32_0 : i32, i32
  }
  func.func @transform_3(%arg0: i32) -> (i32, i32) {
    %c0_i32 = arith.constant 0 : i32
    %c0_i32_0 = arith.constant 0 : i32
    return %arg0, %c0_i32 : i32, i32
  }
  func.func @transform_4(%arg0: i32) -> (i32, i32) {
    %c0_i32 = arith.constant 0 : i32
    %c0_i32_0 = arith.constant 0 : i32
    return %arg0, %c0_i32 : i32, i32
  }
}

</mosaic_0001>

<bundles_post_ra>
// kernel: vq_quantize.1
= control target key start
LH: loop header
LB: loop body
LE: loop exit
PB: predicated region body
PF: predicated region fallthrough
CT: control target
= control target key end

     0   :  { %vm21_vm0 = vcmask 261120   ;;  %v204_v2 = vmov 0.0|0.0   ;;  %vm205_vm2 = vmmov 0   ;;  %v206_v4 = vmov 0.0   ;;  %s260_s0 = inlined_call_operand.vmem [shape: f32[8,32], index: 0, kind: input, shape index: {}]   ;;  %s261_s1 = inlined_call_operand.vmem [shape: f32[16,32], index: 1, kind: input, shape index: {}]   ;;  %s262_s2 = inlined_call_operand.vmem [shape: f32[1,16], index: 2, kind: input, shape index: {}]   ;;  %s263_s3 = inlined_call_operand.hbm [shape: bf16[8,16], index: 3, kind: output, shape index: {0}]   ;;  %s264_s4 = inlined_call_operand.vmem [shape: s32[8,1], index: 4, kind: output, shape index: {1}]  }
   0x1   :  { %v18_v0 = vld [vmem:[%s261_s1] sm:$0xff]  ;;  %v19_v1 = vld [vmem:[%s261_s1 + $0x8] sm:$0xff]  ;;  %172 = vmatprep.subr.bf16.mxu0 %v204_v2  ;;  %vm174_vm1 = vmpackc.low %vm21_vm0, %vm21_vm0  ;;  %169 = vmatprep.mubr.msk.f32.mxu0 %vm205_vm2, %v206_v4 }
   0x2   :  { %v173_v3 = vpack.c.bf16 %v19_v1, %v18_v0 }
   0x3   :  { %10 = vsyncpa [#allocation3], 0  ;;  %v17_v5 = vld [vmem:[%s260_s0] sm:$0xff]  ;;  %vm110_vm3 = vcmask 130048   ;;  %v108_v11 = vlaneseq  ;;  %vm137_vm6 = vcmask 7168   ;;  %s207_s0 = smov [#allocation2]  }
   0x4   :  { %175 = vmatpush3.bf16.xpose.msk.msra.mxu0 %vm174_vm1, %v173_v3  ;;  %v160_v6 = vld [vmem:[%s262_s2] ss:$0 sm:$0xff]  ;;  %s145_s1 = sshll.u32 %s207_s0, 4  ;;  %vm135_vm8 = vcmask 125952   ;;  %s146_s1 = int_to_ptr.vmem [resolvable:$true] %s145_s1 }
   0x5   :  { %v109_v12 = vand.u32 127, %v108_v11  ;;  %s180_s24 = scalar_lea.vmem %s146_s1, 64  ;;  %p185_p1 = scmp.lt.s32.totalorder %s146_s1, %s146_s1 }
   0x6   :  { %p181_p0 = scmp.ne.s32.totalorder %s146_s1, %s180_s24  ;;  %p186_p2 = scmp.lt.s32.totalorder %s180_s24, %s180_s24 }
   0x8   :  { %p187_p3 = por %p186_p2, %p185_p1 }
   0xa   :  { %p188_p4 = pnand %p187_p3, %p181_p0 }
   0xb   :  { %170 = vmatmul.mubr.msk.f32.vlgmr.msra.gmra.mrb[0].mxu0 %vm21_vm0, %v17_v5 }
  0xde   :  { %v97_v7 = vpop.f32.mrb[0].mxu0 }
  0xdf   :  { %v107_v8 = vsub.f32 %v160_v6, %v97_v7  ;;  %v171_v9 = vpop.f32.mrb[1].mxu0 }
  0xe1   :  { %v111_v10 = vsel %vm110_vm3, %v107_v8, inf }
  0xe2   :  { %112 = vmin.xlane.f32.xlu0 %v111_v10 }
 0x16f   :  { %v113_v13 = vpop.xlane.xlu0 %112 }
 0x170   :  { %vm114_vm4 = vcmp.eq.f32.partialorder %v107_v8, %v113_v13 }
 0x171   :  { %v115_v14 = vsel %vm114_vm4, %v109_v12, 16 }
 0x172   :  { %v116_v15 = vsel %vm110_vm3, %v115_v14, 2147483647 }
 0x173   :  { %v118_v16 = vshra.s32 %v116_v15, 16  ;;  %v117_v18 = vand.u32 65535, %v116_v15 }
 0x175   :  { %v120_v17 = vcvt.s32.f32 %v118_v16  ;;  %v119_v20 = vcvt.s32.f32 %v117_v18 }
 0x177   :  { %121 = vmin.xlane.f32.xlu0 %v120_v17 }
 0x204   :  { %v122_v19 = vpop.xlane.xlu0 %121 }
 0x205   :  { %vm123_vm5 = vcmp.eq.f32.partialorder %v120_v17, %v122_v19  ;;  %v128_v22 = vcvt.f32.s32 %v122_v19 }
 0x206   :  { %v124_v21 = vsel %vm123_vm5, %v119_v20, inf }
 0x207   :  { %125 = vmin.xlane.f32.xlu1 %v124_v21  ;;  %v129_v24 = vshll.u32 %v128_v22, 16 }
 0x294   :  { %v126_v23 = vpop.xlane.xlu1 %125 }
 0x295   :  { %v127_v25 = vcvt.f32.s32 %v126_v23 }
 0x297   :  { %v130_v26 = vadd.s32 %v129_v24, %v127_v25 }
 0x299   :  { %vm131_vm7 = vcmp.eq.s32.totalorder %v109_v12, %v130_v26  ;;  %138 = vst.msk [vmem:[%s264_s4] sm:$0xff] %vm137_vm6, %v130_v26 }
 0x29a   :  { %v161_v27 = vsel %vm131_vm7, 1.0, %v206_v4 }
 0x29b   :  { %v134_v28 = vpack.c.bf16 %v161_v27, %v161_v27 }
 0x29d   :  { %136 = vst.msk [vmem:[#allocation2] sm:$0xf] %vm135_vm8, %v134_v28 }
 0x29e   :  { %191 = shalt.err (!%p188_p4)
}
 0x29f   :  { %s192_s27 = scalar_lea.hbm %s263_s3, 64 }
 0x2a0   :  { %p193_p5 = scmp.ne.s32.totalorder %s263_s3, %s192_s27  ;;  %p196_p6 = scmp.lt.u32.totalorder %s192_s27, %s263_s3 }
 0x2a2   :  { %p198_p7 = pnand %p196_p6, %p193_p5 }
 0x2a4   :  { %201 = shalt.err (!%p198_p7)
}
 0x2a5   :  { %148 = dma.vmem_to_hbm [thread:$0]  %s146_s1, 64, %s263_s3, [#allocation3]  }
 0x2a6   :  { %202 = dma.done.wait [#allocation3], 64  }
 0x2a7   :  { %203 = vsyncadd [#allocation3], 4294967232 }
 0x2a8   :  { %156 = vsyncpa [#allocation3], 1 }

</bundles_post_ra>
